<compile_context>
chip_gen: v5e
topology: v5e:2x2
jax: 0.10.0
libtpu: 0.0.40
codegen_flags: <defaults>
</compile_context>

<pallas_src>
import functools

import jax
import jax.numpy as jnp
from jax import lax
from jax.experimental import pallas as pl
from jax.experimental.pallas import tpu as pltpu


def _round_up(a, b):
    return (a + b - 1) // b * b


def _avgpool_kernel(x_ref, o_ref, acc_ref, *, tile_l, true_l, inv_len,
                    n_chunks, n_acc, mask_needed):
    """grid = (row_tiles [parallel], l_tiles [arbitrary / reduction])."""
    k = pl.program_id(1)
    rows = acc_ref.shape[0]

    @pl.when(k == 0)
    def _init():
        acc_ref[...] = jnp.zeros_like(acc_ref)

    def accumulate(apply_mask):
        # Fold this (rows, tile_l) block into per-lane partial sums (rows, 128)
        # using cheap 128-lane slices + VPU adds; the single cross-lane reduce
        # happens only once, in the epilogue.
        if apply_mask:
            lane_iota = lax.broadcasted_iota(jnp.int32, (rows, 128), 1)
            base_col = k * tile_l  # global column offset of this L-tile

        def load_chunk(j):
            if isinstance(j, int):                     # static chunk index
                off = j * 128
                c = x_ref[:, off:off + 128]
            else:                                      # traced chunk index
                off = pl.multiple_of(j * 128, 128)
                c = x_ref[:, pl.ds(off, 128)]
            c = c.astype(jnp.float32)
            if apply_mask:
                # Zero out columns past the true length L (out-of-bounds block
                # reads are undefined, NOT guaranteed zero).
                c = jnp.where(lane_iota + (base_col + off) < true_l, c, 0.0)
            return c

        n_steps = n_chunks // n_acc                    # n_acc divides n_chunks
        if n_steps <= 8:
            # Small chunk count: fully static unroll, round-robin accumulators.
            parts = [jnp.zeros((rows, 128), jnp.float32) for _ in range(n_acc)]
            for j in range(n_chunks):
                parts[j % n_acc] = parts[j % n_acc] + load_chunk(j)
        else:
            # Large chunk count: fori_loop, n_acc independent chunks per step.
            def body(s, carry):
                return tuple(carry[a] + load_chunk(s * n_acc + a)
                             for a in range(n_acc))
            parts = list(lax.fori_loop(
                0, n_steps, body,
                tuple(jnp.zeros((rows, 128), jnp.float32)
                      for _ in range(n_acc))))

        total = parts[0]
        for p in parts[1:]:
            total = total + p
        acc_ref[...] += total

    if mask_needed:
        is_last = k == pl.num_programs(1) - 1

        @pl.when(is_last)
        def _masked():
            accumulate(True)

        @pl.when(jnp.logical_not(is_last))
        def _unmasked():
            accumulate(False)
    else:
        accumulate(False)

    @pl.when(k == pl.num_programs(1) - 1)
    def _epilogue():
        # Single cross-lane reduce (XLU) + scale by 1/L, only at the end.
        o_ref[...] = (jnp.sum(acc_ref[...], axis=-1, keepdims=True)
                      * inv_len).astype(o_ref.dtype)


def avg_pool(x, *, target_block_bytes=8 * 1024 * 1024, max_rows_tile=256):
    """x: (B, C, *spatial) -> (B, C), mean over all spatial positions."""
    B, C = x.shape[0], x.shape[1]
    x2 = x.reshape(B * C, -1)            # free reshape (layout-compatible)
    R, L = x2.shape

    # torch.mean requires float; keep float dtypes, promote others to f32.
    out_dtype = x.dtype if jnp.issubdtype(x.dtype, jnp.floating) else jnp.float32

    if L == 0:
        # Mean over an empty axis (matches torch's NaN behavior), avoids 1/0.
        return jnp.full((B, C), jnp.nan, dtype=out_dtype)

    dtype_bytes = x2.dtype.itemsize
    row_mult = 8 * max(1, 4 // dtype_bytes)      # f32: 8, bf16: 16, int8: 32

    # --- Row tile: dense sublane packing, capped at 256 (wide-and-short). ---
    rows_tile = min(_round_up(R, row_mult), max_rows_tile)
    # v7x megacore: ensure >= 2 tiles on the parallel (row) axis when possible.
    while rows_tile > row_mult and -(-R // rows_tile) < 2:
        rows_tile = _round_up(max(row_mult, rows_tile // 2), row_mult)

    # --- Lane tile: fill the byte budget, multiple of 128, capped by L. -----
    tile_l = target_block_bytes // max(1, rows_tile * dtype_bytes)
    tile_l = max(128, (tile_l // 128) * 128)
    tile_l = min(tile_l, _round_up(L, 128))

    n_chunks = tile_l // 128
    # Independent per-lane partial accumulators (ILP when rows_tile is small);
    # shrink until it divides n_chunks.
    n_acc = max(1, min(4, 256 // rows_tile, n_chunks))
    while n_chunks % n_acc:
        n_acc //= 2

    grid = (pl.cdiv(R, rows_tile), pl.cdiv(L, tile_l))
    mask_needed = (L % tile_l) != 0

    block_bytes = rows_tile * tile_l * dtype_bytes
    vmem_need = 2 * block_bytes + (n_acc + 2) * rows_tile * 128 * 4 + (2 << 20)
    vmem_limit = int(min(max(vmem_need, 32 * 1024 * 1024), 48 * 1024 * 1024))

    kernel = functools.partial(
        _avgpool_kernel,
        tile_l=tile_l, true_l=L, inv_len=1.0 / float(L),
        n_chunks=n_chunks, n_acc=n_acc, mask_needed=mask_needed)

    out = pl.pallas_call(
        kernel,
        out_shape=jax.ShapeDtypeStruct((R, 1), out_dtype),
        grid_spec=pltpu.PrefetchScalarGridSpec(
            num_scalar_prefetch=0,
            grid=grid,
            in_specs=[pl.BlockSpec((rows_tile, tile_l), lambda i, k: (i, k))],
            out_specs=pl.BlockSpec((rows_tile, 1), lambda i, k: (i, 0)),
            scratch_shapes=[pltpu.VMEM((rows_tile, 128), jnp.float32)],
        ),
        compiler_params=pltpu.CompilerParams(
            # Row tiles are independent (engages both TCs on v7x);
            # L axis is the (sequential) reduction.
            dimension_semantics=("parallel", "arbitrary"),
            vmem_limit_bytes=vmem_limit,
        ),
        cost_estimate=pl.CostEstimate(
            flops=int(R) * int(L),
            transcendentals=0,
            bytes_accessed=int(R) * int(L) * dtype_bytes
                           + int(R) * jnp.dtype(out_dtype).itemsize,
        ),
    )(x2)

    return out[:, 0].reshape(B, C)


def _ref(x):
    return jnp.mean(x.reshape(x.shape[0], x.shape[1], -1), axis=2)


if __name__ == "__main__":
    key = jax.random.PRNGKey(0)

    # Main test: shapes implied by the module's forward.
    x = jax.random.normal(key, (2, 4, 16, 16), dtype=jnp.float32)
    out = jax.block_until_ready(avg_pool(x))
    assert out.shape == (2, 4), out.shape
    assert jnp.allclose(out, _ref(x), atol=1e-5, rtol=1e-4)

    # Ragged rows/lanes (R and L not tile multiples -> in-kernel mask path).
    x2 = jax.random.normal(jax.random.PRNGKey(1), (2, 3, 7, 5), dtype=jnp.float32)
    out2 = jax.block_until_ready(avg_pool(x2))
    assert out2.shape == (2, 3), out2.shape
    assert jnp.allclose(out2, _ref(x2), atol=1e-5, rtol=1e-4)

    # Multiple row tiles + ragged last L-tile + fori_loop chunk path.
    x3 = jax.random.normal(jax.random.PRNGKey(2), (4, 5, 37, 29), dtype=jnp.float32)
    out3 = jax.block_until_ready(avg_pool(x3))
    assert out3.shape == (4, 5), out3.shape
    assert jnp.allclose(out3, _ref(x3), atol=1e-5, rtol=1e-4)

    # Force multiple L-tiles (accumulator across the reduction axis) + mask.
    out4 = jax.block_until_ready(avg_pool(x3, target_block_bytes=64 * 1024))
    assert jnp.allclose(out4, _ref(x3), atol=1e-5, rtol=1e-4)

    print("KERNEL_OK")
</pallas_src>

<mosaic_0001>
module attributes {stable_mosaic.version = 11 : i64} {
  func.func @_avgpool_kernel(%arg0: i32, %arg1: i32, %arg2: memref<8x256xf32, #tpu.memory_space<vmem>>, %arg3: memref<8x1xf32, #tpu.memory_space<vmem>>, %arg4: memref<8x128xf32, #tpu.memory_space<vmem>>) attributes {dimension_semantics = [#tpu.dimension_semantics<parallel>, #tpu.dimension_semantics<arbitrary>], iteration_bounds = array<i64: 1, 1>, scalar_prefetch = 0 : i64, scratch_operands = 1 : i64, tpu.core_type = #tpu.core_type<tc>, window_params = [{transform_indices = @transform_0, window_bounds = array<i64: 8, 256>}, {transform_indices = @transform_1, window_bounds = array<i64: 8, 1>}]} {
    %c0_i32 = arith.constant 0 : i32
    %0 = arith.cmpi eq, %arg1, %c0_i32 : i32
    %1 = arith.extui %0 : i1 to i32
    %c0_i32_0 = arith.constant 0 : i32
    %2 = arith.cmpi ne, %1, %c0_i32_0 : i32
    scf.if %2 {
      %cst_10 = arith.constant 0.000000e+00 : f32
      %16 = vector.broadcast %cst_10 : f32 to vector<8x128xf32>
      %c0_11 = arith.constant 0 : index
      %c0_12 = arith.constant 0 : index
      %17 = vector.load %arg4[%c0_11, %c0_12] : memref<8x128xf32, #tpu.memory_space<vmem>>, vector<8x128xf32>
      tpu.vector_store %arg4[%c0_11, %c0_12], %16 {strides = array<i32>} : memref<8x128xf32, #tpu.memory_space<vmem>>, vector<8x128xf32>,
    } else {
    }
    %cst = arith.constant 0.000000e+00 : f32
    %3 = vector.broadcast %cst : f32 to vector<8x128xf32>
    %cst_1 = arith.constant 0.000000e+00 : f32
    %4 = vector.broadcast %cst_1 : f32 to vector<8x128xf32>
    %c0 = arith.constant 0 : index
    %c0_2 = arith.constant 0 : index
    %5 = vector.load %arg2[%c0, %c0_2] : memref<8x256xf32, #tpu.memory_space<vmem>>, vector<8x128xf32>
    %6 = arith.addf %3, %5 : vector<8x128xf32>
    %c0_3 = arith.constant 0 : index
    %c128 = arith.constant 128 : index
    %7 = vector.load %arg2[%c0_3, %c128] : memref<8x256xf32, #tpu.memory_space<vmem>>, vector<8x128xf32>
    %8 = arith.addf %4, %7 : vector<8x128xf32>
    %9 = arith.addf %6, %8 : vector<8x128xf32>
    %c0_4 = arith.constant 0 : index
    %c0_5 = arith.constant 0 : index
    %10 = vector.load %arg4[%c0_4, %c0_5] : memref<8x128xf32, #tpu.memory_space<vmem>>, vector<8x128xf32>
    %11 = arith.addf %10, %9 : vector<8x128xf32>
    %c0_6 = arith.constant 0 : index
    %c0_7 = arith.constant 0 : index
    %12 = vector.load %arg4[%c0_6, %c0_7] : memref<8x128xf32, #tpu.memory_space<vmem>>, vector<8x128xf32>
    tpu.vector_store %arg4[%c0_6, %c0_7], %11 {strides = array<i32>} : memref<8x128xf32, #tpu.memory_space<vmem>>, vector<8x128xf32>,
    %c0_i32_8 = arith.constant 0 : i32
    %13 = arith.cmpi eq, %arg1, %c0_i32_8 : i32
    %14 = arith.extui %13 : i1 to i32
    %c0_i32_9 = arith.constant 0 : i32
    %15 = arith.cmpi ne, %14, %c0_i32_9 : i32
    scf.if %15 {
      %c0_10 = arith.constant 0 : index
      %c0_11 = arith.constant 0 : index
      %16 = vector.load %arg4[%c0_10, %c0_11] : memref<8x128xf32, #tpu.memory_space<vmem>>, vector<8x128xf32>
      %cst_12 = arith.constant dense<0.000000e+00> : vector<8xf32>
      %17 = vector.multi_reduction <add>, %16, %cst_12 [1] : vector<8x128xf32> to vector<8xf32>
      %18 = vector.shape_cast %17 : vector<8xf32> to vector<8x1xf32>
      %cst_13 = arith.constant 3.906250e-03 : f32
      %19 = vector.broadcast %cst_13 : f32 to vector<8x1xf32>
      %20 = arith.mulf %18, %19 : vector<8x1xf32>
      %c0_14 = arith.constant 0 : index
      %c0_15 = arith.constant 0 : index
      %21 = vector.load %arg3[%c0_14, %c0_15] : memref<8x1xf32, #tpu.memory_space<vmem>>, vector<8x1xf32>
      tpu.vector_store %arg3[%c0_14, %c0_15], %20 {strides = array<i32>} : memref<8x1xf32, #tpu.memory_space<vmem>>, vector<8x1xf32>,
    } else {
    }
    return
  }
  func.func @transform_0(%arg0: i32, %arg1: i32) -> (i32, i32) {
    %c0_i32 = arith.constant 0 : i32
    return %arg0, %arg1 : i32, i32
  }
  func.func @transform_1(%arg0: i32, %arg1: i32) -> (i32, i32) {
    %c0_i32 = arith.constant 0 : i32
    %c0_i32_0 = arith.constant 0 : i32
    return %arg0, %c0_i32 : i32, i32
  }
}

</mosaic_0001>

<bundles_post_ra>
// kernel: tpu_custom_call.1
= control target key start
LH: loop header
LB: loop body
LE: loop exit
PB: predicated region body
PF: predicated region fallthrough
CT: control target
= control target key end

     0   :  { %6 = vsyncpa [#allocation4], 0  ;;  %s76_s9 = smov [#allocation3]   ;;  %s93_s0 = inlined_call_operand.hbm [shape: f32[8,256], index: 0, kind: input, shape index: {}]   ;;  %s94_s1 = inlined_call_operand.vmem [shape: f32[8,1], index: 1, kind: output, shape index: {}]  }
   0x1   :  { %s12_s8 = sshll.u32 %s93_s0, 4  ;;  %s14_s10 = sshll.u32 %s76_s9, 4  ;;  %s13_s8 = int_to_ptr.hbm [resolvable:$true] %s12_s8  ;;  %s15_s10 = int_to_ptr.vmem [resolvable:$true] %s14_s10 }
   0x2   :  { %17 = dma.hbm_to_vmem [thread:$0]  %s13_s8, 256, %s15_s10, [#allocation4]  }
   0x3   :  { %74 = dma.done.wait [#allocation4], 256  }
   0x4   :  { %75 = vsyncadd [#allocation4], 4294967040  ;;  %v27_v0 = vld [vmem:[#allocation3] sm:$0xff]  ;;  %v29_v1 = vld [vmem:[#allocation3 + $0x8] sm:$0xff]  ;;  %vm42_vm0 = vcmask 7168  }
   0x5   :  { %v31_v2 = vadd.f32 %v29_v1, %v27_v0 }
   0x7   :  { %39 = vadd.xlane.f32.xlu0 %v31_v2 }
  0x7a   :  { %v40_v3 = vpop.xlane.xlu0 %39 }
  0x7b   :  { %v41_v4 = vmul.f32 0.00390625, %v40_v3 }
  0x7d   :  { %43 = vst.msk [vmem:[%s94_s1] sm:$0xff] %vm42_vm0, %v41_v4 }
  0x7e   :  { %48 = vsyncpa [#allocation4], 1 }

</bundles_post_ra>
